<compile_context>
chip_gen: v5e
topology: v5e:2x2
jax: 0.10.0
libtpu: 0.0.40
codegen_flags: <defaults>
</compile_context>

<pallas_src>
import jax
import jax.numpy as jnp
from jax.experimental import pallas as pl
from jax.experimental.pallas import tpu as pltpu

EPS = 1e-5

# Safe scoped-VMEM ceiling across v5e (128 MiB phys / 16 MiB default),
# v6e (128 / 32) and v7x (64 / 32).
_VMEM_LIMIT_BYTES = 48 * 1024 * 1024
# Target bytes for one x tile (in its own dtype). With double-buffered in+out
# plus ~3x f32 temporaries this stays comfortably under the 48 MiB limit.
_X_TILE_TARGET_BYTES = 4 * 1024 * 1024


def _layernorm_bias_kernel(x_ref, w_ref, b_ref, o_ref):
    # x_ref: (tm, D), w_ref/b_ref: (1, D), o_ref: (tm, D)
    x = x_ref[...].astype(jnp.float32)
    mean = jnp.mean(x, axis=-1, keepdims=True)
    xc = x - mean
    var = jnp.mean(xc * xc, axis=-1, keepdims=True)
    inv = jax.lax.rsqrt(var + EPS)
    y = xc * inv * w_ref[...].astype(jnp.float32) + b_ref[...].astype(jnp.float32)
    o_ref[...] = y.astype(o_ref.dtype)


def _layernorm_nobias_kernel(x_ref, w_ref, o_ref):
    x = x_ref[...].astype(jnp.float32)
    mean = jnp.mean(x, axis=-1, keepdims=True)
    xc = x - mean
    var = jnp.mean(xc * xc, axis=-1, keepdims=True)
    inv = jax.lax.rsqrt(var + EPS)
    y = xc * inv * w_ref[...].astype(jnp.float32)
    o_ref[...] = y.astype(o_ref.dtype)


def _sublane_multiple(dtype):
    # f32 -> 8, bf16 -> 16, int8/fp8 -> 32 (sub-32-bit dtypes pack along sublanes).
    itemsize = jnp.dtype(dtype).itemsize
    return max(8, 32 // max(1, itemsize))


def _round_up(x, m):
    return ((x + m - 1) // m) * m


def _choose_block_rows(M, D, dtype):
    sub = _sublane_multiple(dtype)
    itemsize = jnp.dtype(dtype).itemsize
    # Rows per tile so the x tile is ~_X_TILE_TARGET_BYTES.
    tm = _X_TILE_TARGET_BYTES // max(1, D * itemsize)
    tm = max(sub, (tm // sub) * sub)
    # Never (much) larger than the whole problem.
    m_rounded = _round_up(M, sub)
    tm = min(tm, m_rounded)
    # If the whole problem fits in one tile, split into >=2 grid steps so
    # megacore (v7x: 2 TensorCores) can shard the row grid.
    if m_rounded > sub and tm >= m_rounded:
        tm = max(sub, _round_up(m_rounded // 2, sub))
    return tm


def layer_norm(x, weight, bias=None, *, block_rows=None):
    """LayerNorm over the last dim of x. x: (..., D)."""
    orig_shape = x.shape
    D = orig_shape[-1]
    x2 = x.reshape(-1, D)
    M = x2.shape[0]

    if block_rows is None:
        tm = _choose_block_rows(M, D, x2.dtype)
    else:
        tm = block_rows
    sub = _sublane_multiple(x2.dtype)
    tm = max(sub, (tm // sub) * sub)  # enforce sublane-multiple tiles

    # No wrapper-side pad/slice: ragged last block is masked by Pallas.
    grid = (pl.cdiv(M, tm),)

    row_spec = pl.BlockSpec((tm, D), lambda i: (i, 0))
    vec_spec = pl.BlockSpec((1, D), lambda i: (0, 0))

    compiler_params = pltpu.CompilerParams(
        dimension_semantics=("parallel",),
        vmem_limit_bytes=_VMEM_LIMIT_BYTES,
    )

    w2 = weight.reshape(1, D)
    out_shape = jax.ShapeDtypeStruct((M, D), x.dtype)

    if bias is None:
        out = pl.pallas_call(
            _layernorm_nobias_kernel,
            out_shape=out_shape,
            grid=grid,
            in_specs=[row_spec, vec_spec],
            out_specs=row_spec,
            compiler_params=compiler_params,
        )(x2, w2)
    else:
        b2 = bias.reshape(1, D)
        out = pl.pallas_call(
            _layernorm_bias_kernel,
            out_shape=out_shape,
            grid=grid,
            in_specs=[row_spec, vec_spec, vec_spec],
            out_specs=row_spec,
            compiler_params=compiler_params,
        )(x2, w2, b2)

    # TODO(synk): for production shapes with D < 128, repack rows to a
    # lane-dense (multiple-of-128) output slab to avoid masked partial stores.
    return out.reshape(orig_shape)


def layer_norm_ref(x, weight, bias=None):
    x32 = x.astype(jnp.float32)
    mean = jnp.mean(x32, axis=-1, keepdims=True)
    var = jnp.mean((x32 - mean) ** 2, axis=-1, keepdims=True)
    y = (x32 - mean) / jnp.sqrt(var + EPS)
    y = y * weight.astype(jnp.float32)
    if bias is not None:
        y = y + bias.astype(jnp.float32)
    return y.astype(x.dtype)


if __name__ == "__main__":
    key = jax.random.PRNGKey(0)
    batch, seq, hidden = 2, 8, 32

    x = jax.random.normal(key, (batch, seq, hidden), dtype=jnp.float32)

    # Deterministic parameter init, matching nn.Parameter(torch.ones/zeros(ndim))
    weight = jnp.ones((hidden,), dtype=jnp.float32)
    bias = jnp.zeros((hidden,), dtype=jnp.float32)  # bias=True case

    out = jax.block_until_ready(layer_norm(x, weight, bias))
    ref = layer_norm_ref(x, weight, bias)
    assert jnp.allclose(out, ref, atol=1e-5, rtol=1e-5), "mismatch vs reference"

    # bias=False path (specialized kernel, no zero-bias DMA)
    out_nb = jax.block_until_ready(layer_norm(x, weight, None))
    ref_nb = layer_norm_ref(x, weight, None)
    assert jnp.allclose(out_nb, ref_nb, atol=1e-5, rtol=1e-5), "mismatch (no bias)"

    # Ragged-grid path: row count not a multiple of the tile -> last block masked.
    key2 = jax.random.split(key, 2)[1]
    x_ragged = jax.random.normal(key2, (3, 5, hidden), dtype=jnp.float32)  # M=15
    out_r = jax.block_until_ready(layer_norm(x_ragged, weight, bias, block_rows=8))
    ref_r = layer_norm_ref(x_ragged, weight, bias)
    assert jnp.allclose(out_r, ref_r, atol=1e-5, rtol=1e-5), "mismatch (ragged grid)"

    print("KERNEL_OK")
</pallas_src>

<mosaic_0001>
module attributes {stable_mosaic.version = 11 : i64} {
  func.func @_layernorm_bias_kernel(%arg0: i32, %arg1: memref<8x32xf32, #tpu.memory_space<vmem>>, %arg2: memref<1x32xf32, #tpu.memory_space<vmem>>, %arg3: memref<1x32xf32, #tpu.memory_space<vmem>>, %arg4: memref<8x32xf32, #tpu.memory_space<vmem>>) attributes {dimension_semantics = [#tpu.dimension_semantics<parallel>], iteration_bounds = array<i64: 2>, scalar_prefetch = 0 : i64, scratch_operands = 0 : i64, tpu.core_type = #tpu.core_type<tc>, window_params = [{transform_indices = @transform_0, window_bounds = array<i64: 8, 32>}, {pipeline_mode = #tpu.pipeline_mode<synchronous>, transform_indices = @transform_1, window_bounds = array<i64: 1, 32>}, {pipeline_mode = #tpu.pipeline_mode<synchronous>, transform_indices = @transform_2, window_bounds = array<i64: 1, 32>}, {transform_indices = @transform_3, window_bounds = array<i64: 8, 32>}]} {
    %c0 = arith.constant 0 : index
    %c0_0 = arith.constant 0 : index
    %0 = vector.load %arg1[%c0, %c0_0] : memref<8x32xf32, #tpu.memory_space<vmem>>, vector<8x32xf32>
    %cst = arith.constant dense<0.000000e+00> : vector<8xf32>
    %1 = vector.multi_reduction <add>, %0, %cst [1] : vector<8x32xf32> to vector<8xf32>
    %2 = vector.shape_cast %1 : vector<8xf32> to vector<8x1xf32>
    %cst_1 = arith.constant 3.200000e+01 : f32
    %3 = vector.broadcast %cst_1 : f32 to vector<8x1xf32>
    %4 = arith.divf %2, %3 : vector<8x1xf32>
    %5 = vector.broadcast %4 : vector<8x1xf32> to vector<8x32xf32>
    %6 = arith.subf %0, %5 : vector<8x32xf32>
    %7 = arith.mulf %6, %6 : vector<8x32xf32>
    %cst_2 = arith.constant dense<0.000000e+00> : vector<8xf32>
    %8 = vector.multi_reduction <add>, %7, %cst_2 [1] : vector<8x32xf32> to vector<8xf32>
    %9 = vector.shape_cast %8 : vector<8xf32> to vector<8x1xf32>
    %cst_3 = arith.constant 3.200000e+01 : f32
    %10 = vector.broadcast %cst_3 : f32 to vector<8x1xf32>
    %11 = arith.divf %9, %10 : vector<8x1xf32>
    %cst_4 = arith.constant 9.99999974E-6 : f32
    %12 = vector.broadcast %cst_4 : f32 to vector<8x1xf32>
    %13 = arith.addf %11, %12 : vector<8x1xf32>
    %14 = math.rsqrt %13 : vector<8x1xf32>
    %15 = vector.broadcast %14 : vector<8x1xf32> to vector<8x32xf32>
    %16 = arith.mulf %6, %15 : vector<8x32xf32>
    %c0_5 = arith.constant 0 : index
    %c0_6 = arith.constant 0 : index
    %17 = vector.load %arg2[%c0_5, %c0_6] : memref<1x32xf32, #tpu.memory_space<vmem>>, vector<1x32xf32>
    %18 = vector.broadcast %17 : vector<1x32xf32> to vector<8x32xf32>
    %19 = arith.mulf %16, %18 : vector<8x32xf32>
    %c0_7 = arith.constant 0 : index
    %c0_8 = arith.constant 0 : index
    %20 = vector.load %arg3[%c0_7, %c0_8] : memref<1x32xf32, #tpu.memory_space<vmem>>, vector<1x32xf32>
    %21 = vector.broadcast %20 : vector<1x32xf32> to vector<8x32xf32>
    %22 = arith.addf %19, %21 : vector<8x32xf32>
    %c0_9 = arith.constant 0 : index
    %c0_10 = arith.constant 0 : index
    %23 = vector.load %arg4[%c0_9, %c0_10] : memref<8x32xf32, #tpu.memory_space<vmem>>, vector<8x32xf32>
    tpu.vector_store %arg4[%c0_9, %c0_10], %22 {strides = array<i32>} : memref<8x32xf32, #tpu.memory_space<vmem>>, vector<8x32xf32>,
    return
  }
  func.func @transform_0(%arg0: i32) -> (i32, i32) {
    %c0_i32 = arith.constant 0 : i32
    %c0_i32_0 = arith.constant 0 : i32
    return %arg0, %c0_i32 : i32, i32
  }
  func.func @transform_1(%arg0: i32) -> (i32, i32) {
    %c0_i32 = arith.constant 0 : i32
    %c0_i32_0 = arith.constant 0 : i32
    %c0_i32_1 = arith.constant 0 : i32
    return %c0_i32, %c0_i32_0 : i32, i32
  }
  func.func @transform_2(%arg0: i32) -> (i32, i32) {
    %c0_i32 = arith.constant 0 : i32
    %c0_i32_0 = arith.constant 0 : i32
    %c0_i32_1 = arith.constant 0 : i32
    return %c0_i32, %c0_i32_0 : i32, i32
  }
  func.func @transform_3(%arg0: i32) -> (i32, i32) {
    %c0_i32 = arith.constant 0 : i32
    %c0_i32_0 = arith.constant 0 : i32
    return %arg0, %c0_i32 : i32, i32
  }
}

</mosaic_0001>

<bundles_post_ra>
// kernel: tpu_custom_call.1
= control target key start
LH: loop header
LB: loop body
LE: loop exit
PB: predicated region body
PF: predicated region fallthrough
CT: control target
= control target key end

     0   :  { %8 = vsyncpa [#allocation3], 0  ;;  %s721_s0 = inlined_call_operand.hbm [shape: f32[16,32], index: 0, kind: input, shape index: {}]   ;;  %s722_s1 = inlined_call_operand.hbm [shape: f32[1,32], index: 1, kind: input, shape index: {}]   ;;  %s723_s2 = inlined_call_operand.vmem [shape: f32[1,32], index: 2, kind: input, shape index: {}]   ;;  %s724_s3 = inlined_call_operand.hbm [shape: f32[16,32], index: 3, kind: output, shape index: {}]  }
   0x1   :  { %10 = vsyncpa [#allocation3 + $0x1], 0 }
   0x2   :  { %11 = vsyncpa [#allocation6], 0 }
   0x3   :  { %12 = vsyncpa [#allocation4], 0 }
   0x4   :  { %14 = vsyncpa [#allocation4 + $0x1], 0  ;;  %s573_s12 = smov 0   ;;  %s575_s13 = smov 0  }
   0x5   :  { %s577_s14 = smov 0   ;;  %s579_s15 = smov 0  }
   0x6 LB: > { %s594_s16 = sadd.s32 4294967295, %s549_s15   ;;  %s341_s17 = sadd.s32 4294967294, %s549_s15   ;;  %s549_s15 = sphi %s579_s15, %s734_s15   ;;  %s545_s14 = sphi %s577_s14, %s733_s14   ;;  %s541_s13 = sphi %s575_s13, %s732_s13   ;;  %s537_s12 = sphi %s573_s12, %s731_s12  }
   0x7   : > { %p40_p0 = scmp.ne.s32.totalorder %s541_s13, %s537_s12  ;;  %p41_p1 = scmp.eq.s32.totalorder %s594_s16, 0 }
   0x8   : > { %p106_p2 = scmp.eq.s32.totalorder %s594_s16, 1  ;;  %p112_p3 = scmp.eq.s32.totalorder %s341_s17, 1 }
   0x9   : > { %p603_p4 = por %p41_p1, %p40_p0  ;;  %p342_p5 = scmp.ge.s32.totalorder %s549_s15, 1 }
   0xa   : > { %p608_p6 = por %p112_p3, %p40_p0  ;;  %p119_p7 = scmp.lt.s32.totalorder %s549_s15, 3 }
   0xb   : > { %s131_s22 = sshll.u32 %s722_s1, 4  ;;  %s551_s24 = smov [#allocation5]   ;;  %s132_s22 = int_to_ptr.hbm [resolvable:$true] %s131_s22 }
   0xc   : > { %p616_p8 = pnand %p342_p5, %p119_p7  ;;  %s133_s25 = sshll.u32 %s551_s24, 4  ;;  %s134_s25 = int_to_ptr.vmem [resolvable:$true] %s133_s25 }
   0xd   : > { %s626_s26 = sadd.s32 1, %s549_s15   ;;  %s27_s27 = sadd.s32 1, %s545_s14 }
   0xe   : > { %p363_p10 = pneg %p616_p8  ;;  %s24_s28 = ssub.s32 %s549_s15, %s626_s26 }
   0xf   : > { %p25_p12 = scmp.eq.s32.totalorder %s24_s28, 0  ;;  %p34_p13 = scmp.ne.s32.totalorder %s545_s14, %s541_s13 }
  0x10   : > { %p364_p11 = pnand %p363_p10, %p41_p1  ;;  %p35_p0 = scmp.eq.s32.totalorder %s549_s15, 0 }
  0x11   : > { %s635_s29 = scalar_select %p25_p12, %s545_s14, %s27_s27  }
  0x12   : > { %366 = dma.hbm_to_vmem [thread:$0]  (!%p364_p11), %s132_s22, 16, %s134_s25, [#allocation6]  }
  0x13   : > { %p639_p3 = por %p106_p2, %p34_p13  ;;  %p376_p5 = scmp.lt.s32.totalorder %s549_s15, 2 }
  0x14   : > { %s147_s4 = sand.u32 1, %s545_s14   ;;  %s346_s5 = sshll.u32 %s549_s15, 3 }
  0x15   : > { %p36_p7 = por %p35_p0, %p34_p13  ;;  %s345_s6 = sshll.u32 %s147_s4, 3 }
  0x16   : > { %s155_s9 = scalar_lea.hbm %s721_s0, %s346_s5  ;;  %s151_s11 = scalar_lea.vmem [#allocation2], %s345_s6 }
  0x17   : > { %s157_s10 = sshll.u32 %s155_s9, 4  ;;  %s159_s17 = sshll.u32 %s151_s11, 4  ;;  %s158_s10 = int_to_ptr.hbm [resolvable:$true] %s157_s10  ;;  %s160_s17 = int_to_ptr.vmem [resolvable:$true] %s159_s17 }
  0x18   : > { %p649_p10 = pnand %p376_p5, %p36_p7  ;;  %s148_s21 = scalar_lea.sflag [#allocation3], %s147_s4 }
  0x19   : > { %s449_s22 = sshra.s32 %s158_s10, 4  ;;  %s456_s28 = scalar_lea.hbm %s721_s0, 16  ;;  %s450_s22 = int_to_ptr.hbm [resolvable:$true] %s449_s22 }
  0x1a   : > { %s451_s24 = scalar_lea.hbm %s450_s22, 8  ;;  %p453_p11 = pneg %p649_p10 }
  0x1b   : > { %p452_p2 = scmp.ne.s32.totalorder %s450_s22, %s451_s24  ;;  %p457_p0 = scmp.lt.s32.totalorder %s450_s22, %s721_s0 }
  0x1c   : > { %p458_p5 = scmp.lt.s32.totalorder %s456_s28, %s451_s24 }
  0x1d   : > { %p454_p12 = pnand %p453_p11, %p452_p2 }
  0x1e   : > { %p459_p7 = por %p458_p5, %p457_p0 }
  0x1f   : > { %p455_p13 = pneg %p454_p12 }
  0x21   : > { %p460_p9 = pnand %p459_p7, %p455_p13 }
  0x23   : > { %463 = shalt.err (!%p460_p9)
}
  0x24   : > { %370 = dma.hbm_to_vmem [thread:$0]  (!%p649_p10), %s158_s10, 128, %s160_s17, %s148_s21  }
  0x25   : > { %168 = sbr.rel (%p616_p8) target bundleno = 317 (0x13d), region = 32  ;;  %s666_s4 = sand.u32 (!%p616_p8), 1, %s541_s13  }
  0x26   : > { %s348_s7 = sshll.u32 (!%p616_p8), %s666_s4, 3  ;;  %s171_s8 = scalar_lea.sflag (!%p616_p8), [#allocation3], %s666_s4 }
  0x27   : > { %s174_s9 = scalar_lea.vmem (!%p616_p8), [#allocation2], %s348_s7 }
  0x2a   : > { %524 = dma.done.wait (%p603_p4), %s171_s8, 128  }
  0x2b   : > { %526 = vsyncadd (%p603_p4), %s171_s8, 4294967168 }
  0x2c   : > { %528 = dma.done.wait (%p41_p1), [#allocation6], 16  }
  0x2d   : > { %530 = vsyncadd (%p41_p1), [#allocation6], 4294967280  ;;  %vm204_vm0 = vcmask 261120   ;;  %v203_v0 = vld [vmem:[%s174_s9] sm:$0xff]  ;;  %v552_v2 = vmov 32.0   ;;  %s352_s18 = sshll.u32 %s594_s16, 3 }
  0x2e   : > { %v205_v1 = vsel %vm204_vm0, %v203_v0, 0.0  ;;  %415 = vrcp.f32 %v552_v2  ;;  %v413_v23 = vld [vmem:[#allocation5] ss:$0 sm:$0xff]  ;;  %s256_s11 = scalar_lea.hbm %s724_s3, %s352_s18  ;;  %v414_v26 = vld [vmem:[%s723_s2] ss:$0 sm:$0xff]  ;;  %s202_s21 = scalar_lea.vmem [#allocation7], %s348_s7 }
  0x2f   : > { %206 = vadd.xlane.f32.xlu0 %v205_v1  ;;  %s258_s22 = sshll.u32 %s202_s21, 4  ;;  %s260_s16 = sshll.u32 %s256_s11, 4  ;;  %s259_s22 = int_to_ptr.vmem [resolvable:$true] %s258_s22  ;;  %s261_s16 = int_to_ptr.hbm [resolvable:$true] %s260_s16 }
  0x30   : > { %s246_s24 = scalar_lea.sflag [#allocation4], %s666_s4  ;;  %s493_s25 = sshra.s32 %s261_s16, 4  ;;  %s494_s25 = int_to_ptr.hbm [resolvable:$true] %s493_s25 }
  0x31   : > { %s495_s27 = scalar_lea.hbm %s494_s25, 8  ;;  %s499_s6 = scalar_lea.hbm %s724_s3, 16 }
  0x32   : > { %p496_p1 = scmp.ne.s32.totalorder %s494_s25, %s495_s27  ;;  %p500_p9 = scmp.lt.s32.totalorder %s494_s25, %s724_s3 }
  0x33   : > { %p501_p10 = scmp.lt.s32.totalorder %s499_s6, %s495_s27 }
  0x34   : > { %v416_v3 = vpop.eup %415  ;;  %p497_p4 = pnand %p496_p1, %p639_p3 }
  0x35   : > { %v209_v4 = vmul.f32 32.0, %v416_v3  ;;  %vm213_vm1 = vweird.f32 %v416_v3  ;;  %p502_p2 = por %p501_p10, %p500_p9 }
  0x36   : > { %p498_p8 = pneg %p497_p4 }
  0x37   : > { %v210_v5 = vsub.f32 1.0, %v209_v4 }
  0x38   : > { %p503_p11 = pnand %p502_p2, %p498_p8 }
  0x39   : > { %v211_v6 = vmul.f32 %v416_v3, %v210_v5 }
  0x3b   : > { %v212_v7 = vadd.f32 %v416_v3, %v211_v6 }
  0x3d   : > { %v214_v8 = vsel %vm213_vm1, %v416_v3, %v212_v7 }
  0xa2   : > { %v207_v9 = vpop.xlane.xlu0 %206 }
  0xa3   : > { %v215_v10 = vmul.f32 %v214_v8, %v207_v9 }
  0xa5   : > { %v216_v11 = vsub.f32 %v203_v0, %v215_v10 }
  0xa7   : > { %v217_v12 = vmul.f32 %v216_v11, %v216_v11 }
  0xa9   : > { %v218_v13 = vsel %vm204_vm0, %v217_v12, 0.0 }
  0xaa   : > { %219 = vadd.xlane.f32.xlu0 %v218_v13 }
 0x11d   : > { %v220_v14 = vpop.xlane.xlu0 %219 }
 0x11e   : > { %v221_v15 = vmul.f32 %v220_v14, %v214_v8 }
 0x120   : > { %v222_v16 = vadd.f32 1e-05, %v221_v15 }
 0x122   : > { %417 = vrsqrt.f32 %v222_v16  ;;  %vm229_vm3 = vweird.f32 %v222_v16 }
 0x128   : > { %v418_v17 = vpop.eup %417 }
 0x129   : > { %v224_v18 = vmul.f32 %v418_v17, %v222_v16  ;;  %vm230_vm2 = vweird.f32 %v418_v17 }
 0x12a   : > { %vm231_vm4 = vmor %vm229_vm3, %vm230_vm2 }
 0x12b   : > { %v225_v19 = vmul.f32 %v418_v17, %v224_v18 }
 0x12d   : > { %v226_v20 = vmul.f32 0.5, %v225_v19 }
 0x12f   : > { %v227_v21 = vsub.f32 1.5, %v226_v20 }
 0x131   : > { %v228_v22 = vmul.f32 %v418_v17, %v227_v21 }
 0x133   : > { %v232_v24 = vsel %vm231_vm4, %v418_v17, %v228_v22 }
 0x134   : > { %v233_v25 = vmul.f32 %v232_v24, %v216_v11 }
 0x136   : > { %v238_v27 = vmul.f32 %v413_v23, %v233_v25 }
 0x138   : > { %v243_v28 = vadd.f32 %v414_v26, %v238_v27 }
 0x13a   : > { %244 = vst.msk [vmem:[%s202_s21] sm:$0xff] %vm204_vm0, %v243_v28 }
 0x13b   : > { %506 = shalt.err (!%p503_p11)
}
 0x13c   : > { %361 = dma.vmem_to_hbm [thread:$0]  (%p639_p3), %s259_s22, 128, %s261_s16, %s246_s24  }
 0x13d PF: > { %s272_s4 = sand.u32 1, %s537_s12   ;;  %p730_p12 = scmp.ge.s32.totalorder %s549_s15, 2 }
 0x13e   : > { %s273_s9 = scalar_lea.sflag [#allocation4], %s272_s4 }
 0x13f   : > { %p372_p13 = pnand %p730_p12, %p608_p6 }
 0x141   : > { %p373_p0 = pneg %p372_p13 }
 0x143   : > { %532 = dma.done.wait (%p373_p0), %s273_s9, 128  }
 0x144   : > { %534 = vsyncadd (%p373_p0), %s273_s9, 4294967168  ;;  %p17_p5 = scmp.ge.s32.totalorder %s626_s26, 4   ;;  %s731_s12 = smov %s541_s13 }
 0x145   : > { %s732_s13 = smov %s545_s14  ;;  %s733_s14 = smov %s635_s29 }
 0x146   : > { %s734_s15 = smov %s626_s26  ;;  %19 = sbr.rel (!%p17_p5) target bundleno = 6 (0x6), region = 81 }
 0x14b   :  { %279 = vsyncpa [#allocation3], 1 }
 0x14c   :  { %281 = vsyncpa [#allocation3 + $0x1], 1 }
 0x14d   :  { %282 = vsyncpa [#allocation6], 1 }
 0x14e   :  { %283 = vsyncpa [#allocation4], 1 }
 0x14f   :  { %285 = vsyncpa [#allocation4 + $0x1], 1 }

</bundles_post_ra>
